<compile_context>
chip_gen: v7x
topology: tpu7x:2x2x1
jax: 0.10.0
libtpu: 0.0.40
codegen_flags: <defaults>
</compile_context>

<pallas_src>
import functools
import math

import jax
import jax.numpy as jnp
from jax.experimental import pallas as pl
from jax.experimental.pallas import tpu as pltpu


# ----------------------------------------------------------------------------
# Fused encoder-block kernel: one grid step per batch item.
# ----------------------------------------------------------------------------
def _encoder_block_kernel(valid_ref, x_ref, wqkv_ref, wo_ref,
                          ln1_g_ref, ln1_b_ref,
                          w1_ref, b1_ref, w2_ref, b2_ref,
                          ln2_g_ref, ln2_b_ref,
                          out_ref, *, num_heads, head_dim):
    b = pl.program_id(0)

    x = x_ref[...]                                   # (S, D) f32
    S = x.shape[0]
    Hd = num_heads * head_dim
    x_bf = x.astype(jnp.bfloat16)

    # --- fused QKV projection: single wide MXU matmul, f32 accumulation -----
    qkv = jnp.dot(x_bf, wqkv_ref[...], preferred_element_type=jnp.float32)  # (S, 3*Hd)
    q = qkv[:, :Hd]
    k = qkv[:, Hd:2 * Hd]
    v = qkv[:, 2 * Hd:]

    # --- masked-softmax attention, per head (static slices) -----------------
    vl = valid_ref[b]                                # scalar int32 from SMEM
    col = jax.lax.broadcasted_iota(jnp.int32, (S, S), 1)
    mask = col < vl
    inv_sqrt_d = jnp.float32(1.0 / math.sqrt(head_dim))

    head_outs = []
    for h in range(num_heads):                       # static Python loop, num_heads small
        sl = slice(h * head_dim, (h + 1) * head_dim)
        qh = q[:, sl].astype(jnp.bfloat16)
        kh = k[:, sl].astype(jnp.bfloat16)
        vh = v[:, sl].astype(jnp.bfloat16)
        # contract last dims directly -- no explicit transpose of kh
        scores = jax.lax.dot_general(
            qh, kh, (((1,), (1,)), ((), ())),
            preferred_element_type=jnp.float32) * inv_sqrt_d       # (S, S) f32
        scores = jnp.where(mask, scores, jnp.float32(-1.0e6))
        m = jnp.max(scores, axis=-1, keepdims=True)
        e = jnp.exp(scores - m)
        attn = e * pl.reciprocal(jnp.sum(e, axis=-1, keepdims=True), approx=True)
        # TODO(synk): dropout omitted (module uses dropout=0 / eval-mode identity).
        head_outs.append(jnp.dot(attn.astype(jnp.bfloat16), vh,
                                 preferred_element_type=jnp.float32))
    heads = jnp.concatenate(head_outs, axis=-1)      # (S, Hd) f32

    # --- single output projection with contraction K = Hd -------------------
    attn_out = jnp.dot(heads.astype(jnp.bfloat16), wo_ref[...],
                       preferred_element_type=jnp.float32)          # (S, D)

    # --- AddNorm / FFN / AddNorm (all f32 elementwise) -----------------------
    def layer_norm(y, g, beta):
        mu = jnp.mean(y, axis=-1, keepdims=True)
        var = jnp.mean((y - mu) ** 2, axis=-1, keepdims=True)
        return (y - mu) * jax.lax.rsqrt(var + 1e-5) * g + beta

    x1 = layer_norm(x + attn_out, ln1_g_ref[...], ln1_b_ref[...])

    h1 = jnp.dot(x1.astype(jnp.bfloat16), w1_ref[...],
                 preferred_element_type=jnp.float32) + b1_ref[...]   # (S, F)
    h1 = jnp.where(h1 > 0, h1, 0.01 * h1)            # LeakyReLU(negative_slope=0.01)
    y = jnp.dot(h1.astype(jnp.bfloat16), w2_ref[...],
                preferred_element_type=jnp.float32) + b2_ref[...]    # (S, D)

    out_ref[...] = layer_norm(x1 + y, ln2_g_ref[...], ln2_b_ref[...])


def encoder_block_pallas(X, valid_lens, p, num_heads):
    """One EncoderBlock forward: MHA + AddNorm + FFN + AddNorm, fused in one kernel."""
    B, S, D = X.shape
    Hd = p['wq'].shape[1]
    head_dim = Hd // num_heads
    F = p['w1'].shape[1]

    # bf16 weights for the MXU; biases / LayerNorm params stay f32.
    wqkv = jnp.concatenate([p['wq'], p['wk'], p['wv']], axis=1).astype(jnp.bfloat16)
    wo = p['wo'].astype(jnp.bfloat16)
    w1 = p['w1'].astype(jnp.bfloat16)
    w2 = p['w2'].astype(jnp.bfloat16)
    ln1_g = p['ln1_g'].reshape(1, D)
    ln1_b = p['ln1_b'].reshape(1, D)
    ln2_g = p['ln2_g'].reshape(1, D)
    ln2_b = p['ln2_b'].reshape(1, D)
    b1 = p['b1'].reshape(1, F)
    b2 = p['b2'].reshape(1, D)

    kernel = functools.partial(_encoder_block_kernel,
                               num_heads=num_heads, head_dim=head_dim)

    return pl.pallas_call(
        kernel,
        out_shape=jax.ShapeDtypeStruct((B, S, D), jnp.float32),
        grid_spec=pltpu.PrefetchScalarGridSpec(
            num_scalar_prefetch=1,              # valid_lens -> SMEM
            grid=(B,),
            in_specs=[
                pl.BlockSpec((None, S, D), lambda b, vl: (b, 0, 0)),   # X (squeezed)
                pl.BlockSpec((D, 3 * Hd), lambda b, vl: (0, 0)),       # W_qkv
                pl.BlockSpec((Hd, D), lambda b, vl: (0, 0)),           # W_o
                pl.BlockSpec((1, D), lambda b, vl: (0, 0)),            # ln1 gamma
                pl.BlockSpec((1, D), lambda b, vl: (0, 0)),            # ln1 beta
                pl.BlockSpec((D, F), lambda b, vl: (0, 0)),            # W_1
                pl.BlockSpec((1, F), lambda b, vl: (0, 0)),            # b_1
                pl.BlockSpec((F, D), lambda b, vl: (0, 0)),            # W_2
                pl.BlockSpec((1, D), lambda b, vl: (0, 0)),            # b_2
                pl.BlockSpec((1, D), lambda b, vl: (0, 0)),            # ln2 gamma
                pl.BlockSpec((1, D), lambda b, vl: (0, 0)),            # ln2 beta
            ],
            out_specs=pl.BlockSpec((None, S, D), lambda b, vl: (b, 0, 0)),
        ),
        compiler_params=pltpu.CompilerParams(
            dimension_semantics=("parallel",)),
    )(valid_lens.astype(jnp.int32), X, wqkv, wo,
      ln1_g, ln1_b, w1, b1, w2, b2, ln2_g, ln2_b)


# ----------------------------------------------------------------------------
# Full TransformerEncoder forward (embedding / pos-encoding in the wrapper).
# ----------------------------------------------------------------------------
def position_encoding(max_len, d):
    pos = jnp.arange(max_len, dtype=jnp.float32)[:, None]
    freq = jnp.power(10000.0, jnp.arange(0, d, 2, dtype=jnp.float32) / d)
    x = pos / freq
    P = jnp.zeros((max_len, d), jnp.float32)
    P = P.at[:, 0::2].set(jnp.sin(x))
    P = P.at[:, 1::2].set(jnp.cos(x))
    return P


def transformer_encoder_forward(tokens, valid_lens, params, num_heads):
    D = params['emb'].shape[1]
    S = tokens.shape[1]
    if valid_lens is None:
        valid_lens = jnp.full((tokens.shape[0],), S, dtype=jnp.int32)
    # TODO(synk): embedding gather (data-dependent row lookup) + positional-encoding add
    # are left to XLA; each encoder block below runs as one fused Pallas kernel.
    X = jnp.take(params['emb'], tokens, axis=0) * math.sqrt(D) \
        + params['pos'][None, :S, :]
    for p in params['layers']:
        X = encoder_block_pallas(X, valid_lens, p, num_heads)
    return X


# ----------------------------------------------------------------------------
# Pure-JAX reference (f32), transcribing the PyTorch module semantics.
# ----------------------------------------------------------------------------
def _reference_block(X, valid_lens, p, num_heads):
    B, S, D = X.shape

    def split(t):
        t = t.reshape(B, S, num_heads, -1).transpose(0, 2, 1, 3)
        return t.reshape(B * num_heads, S, -1)

    q, k, v = split(X @ p['wq']), split(X @ p['wk']), split(X @ p['wv'])
    d = q.shape[-1]
    scores = jnp.einsum('bqd,bkd->bqk', q, k) / math.sqrt(d)
    vl = jnp.repeat(valid_lens, num_heads)
    col = jnp.arange(S)
    scores = jnp.where(col[None, None, :] < vl[:, None, None], scores,
                       jnp.float32(-1.0e6))
    attn = jax.nn.softmax(scores, axis=-1)
    o = jnp.einsum('bqk,bkd->bqd', attn, v)
    o = o.reshape(B, num_heads, S, d).transpose(0, 2, 1, 3).reshape(B, S, -1)
    attn_out = o @ p['wo']

    def ln(y, g, b):
        mu = y.mean(-1, keepdims=True)
        var = ((y - mu) ** 2).mean(-1, keepdims=True)
        return (y - mu) / jnp.sqrt(var + 1e-5) * g + b

    X1 = ln(X + attn_out, p['ln1_g'], p['ln1_b'])
    h = X1 @ p['w1'] + p['b1']
    h = jnp.where(h > 0, h, 0.01 * h)
    Y = h @ p['w2'] + p['b2']
    return ln(X1 + Y, p['ln2_g'], p['ln2_b'])


def reference_encoder(tokens, valid_lens, params, num_heads):
    D = params['emb'].shape[1]
    X = params['emb'][tokens] * math.sqrt(D) + params['pos'][None, :tokens.shape[1], :]
    for p in params['layers']:
        X = _reference_block(X, valid_lens, p, num_heads)
    return X


# ----------------------------------------------------------------------------
# Deterministic parameter init (torch-like layouts: Linear passes W^T = (in, out)).
# ----------------------------------------------------------------------------
def init_params(key, vocab_size, num_hiddens, num_heads, ffn_hidden, num_layers):
    D = num_hiddens
    keys = jax.random.split(key, 1 + num_layers)
    # Test-only init scale: keep post-sqrt(D) embedding magnitudes O(1) so bf16-MXU
    # rounding stays well inside the verification tolerance.
    emb = jax.random.normal(keys[0], (vocab_size, D), jnp.float32) / math.sqrt(D)
    pos = position_encoding(1000, D)

    def lin(k, in_f, out_f, bias=False):
        kw, kb = jax.random.split(k)
        bound = 1.0 / math.sqrt(in_f)
        w = jax.random.uniform(kw, (out_f, in_f), jnp.float32, -bound, bound).T
        if bias:
            b = jax.random.uniform(kb, (out_f,), jnp.float32, -bound, bound)
            return w, b
        return w

    layers = []
    for i in range(num_layers):
        ks = jax.random.split(keys[1 + i], 6)
        wq = lin(ks[0], D, D)
        wk = lin(ks[1], D, D)
        wv = lin(ks[2], D, D)
        wo = lin(ks[3], D, D)
        w1, b1 = lin(ks[4], D, ffn_hidden, bias=True)
        w2, b2 = lin(ks[5], ffn_hidden, D, bias=True)
        layers.append(dict(
            wq=wq, wk=wk, wv=wv, wo=wo,
            ln1_g=jnp.ones((D,), jnp.float32), ln1_b=jnp.zeros((D,), jnp.float32),
            w1=w1, b1=b1, w2=w2, b2=b2,
            ln2_g=jnp.ones((D,), jnp.float32), ln2_b=jnp.zeros((D,), jnp.float32)))
    return dict(emb=emb, pos=pos, layers=layers)


if __name__ == "__main__":
    vocab_size = 64
    B, S = 2, 8
    num_hiddens, num_heads = 32, 4
    ffn_hidden, num_layers = 64, 2

    key = jax.random.PRNGKey(0)
    k_tok, k_par = jax.random.split(key)
    tokens = jax.random.randint(k_tok, (B, S), 0, vocab_size, dtype=jnp.int32)
    valid_lens = jnp.array([5, 8], dtype=jnp.int32)

    params = init_params(k_par, vocab_size, num_hiddens, num_heads,
                         ffn_hidden, num_layers)

    out = transformer_encoder_forward(tokens, valid_lens, params, num_heads)
    out = jax.block_until_ready(out)

    ref = reference_encoder(tokens, valid_lens, params, num_heads)
    assert out.shape == (B, S, num_hiddens)
    # bf16 MXU operands + approximate softmax reciprocal vs an all-f32 reference:
    # tolerance loosened accordingly (values are O(1) after LayerNorm).
    assert jnp.allclose(out, ref, atol=3e-2, rtol=3e-2), "mismatch vs reference"

    print("KERNEL_OK")
</pallas_src>

<mosaic_0001>
module attributes {stable_mosaic.version = 11 : i64} {
  func.func @_encoder_block_kernel(%arg0: i32, %arg1: memref<2xi32, #tpu.memory_space<smem>>, %arg2: memref<1x8x32xf32, #tpu.memory_space<vmem>>, %arg3: memref<32x96xbf16, #tpu.memory_space<vmem>>, %arg4: memref<32x32xbf16, #tpu.memory_space<vmem>>, %arg5: memref<1x32xf32, #tpu.memory_space<vmem>>, %arg6: memref<1x32xf32, #tpu.memory_space<vmem>>, %arg7: memref<32x64xbf16, #tpu.memory_space<vmem>>, %arg8: memref<1x64xf32, #tpu.memory_space<vmem>>, %arg9: memref<64x32xbf16, #tpu.memory_space<vmem>>, %arg10: memref<1x32xf32, #tpu.memory_space<vmem>>, %arg11: memref<1x32xf32, #tpu.memory_space<vmem>>, %arg12: memref<1x32xf32, #tpu.memory_space<vmem>>, %arg13: memref<1x8x32xf32, #tpu.memory_space<vmem>>) attributes {dimension_semantics = [#tpu.dimension_semantics<parallel>], iteration_bounds = array<i64: 2>, scalar_prefetch = 1 : i64, scratch_operands = 0 : i64, tpu.core_type = #tpu.core_type<tc>, window_params = [{transform_indices = @transform_0, window_bounds = array<i64: 1, 8, 32>}, {pipeline_mode = #tpu.pipeline_mode<synchronous>, transform_indices = @transform_1, window_bounds = array<i64: 32, 96>}, {pipeline_mode = #tpu.pipeline_mode<synchronous>, transform_indices = @transform_2, window_bounds = array<i64: 32, 32>}, {pipeline_mode = #tpu.pipeline_mode<synchronous>, transform_indices = @transform_3, window_bounds = array<i64: 1, 32>}, {pipeline_mode = #tpu.pipeline_mode<synchronous>, transform_indices = @transform_4, window_bounds = array<i64: 1, 32>}, {pipeline_mode = #tpu.pipeline_mode<synchronous>, transform_indices = @transform_5, window_bounds = array<i64: 32, 64>}, {pipeline_mode = #tpu.pipeline_mode<synchronous>, transform_indices = @transform_6, window_bounds = array<i64: 1, 64>}, {pipeline_mode = #tpu.pipeline_mode<synchronous>, transform_indices = @transform_7, window_bounds = array<i64: 64, 32>}, {pipeline_mode = #tpu.pipeline_mode<synchronous>, transform_indices = @transform_8, window_bounds = array<i64: 1, 32>}, {pipeline_mode = #tpu.pipeline_mode<synchronous>, transform_indices = @transform_9, window_bounds = array<i64: 1, 32>}, {pipeline_mode = #tpu.pipeline_mode<synchronous>, transform_indices = @transform_10, window_bounds = array<i64: 1, 32>}, {transform_indices = @transform_11, window_bounds = array<i64: 1, 8, 32>}]} {
    %c0 = arith.constant 0 : index
    %c0_0 = arith.constant 0 : index
    %c0_1 = arith.constant 0 : index
    %0 = vector.load %arg2[%c0, %c0_0, %c0_1] : memref<1x8x32xf32, #tpu.memory_space<vmem>>, vector<1x8x32xf32>
    %1 = vector.shape_cast %0 : vector<1x8x32xf32> to vector<8x32xf32>
    %2 = arith.truncf %1 : vector<8x32xf32> to vector<8x32xbf16>
    %c0_2 = arith.constant 0 : index
    %c0_3 = arith.constant 0 : index
    %3 = vector.load %arg3[%c0_2, %c0_3] : memref<32x96xbf16, #tpu.memory_space<vmem>>, vector<32x96xbf16>
    %cst = arith.constant dense<0.000000e+00> : vector<8x96xf32>
    %4 = tpu.matmul %2, %3, %cst {dimension_numbers = #tpu.dot_dimension_numbers<[1], [0], [0], [1], [0, 0, 1, 1], [], []>} : vector<8x32xbf16>, vector<32x96xbf16>, vector<8x96xf32> -> vector<8x96xf32>
    %5 = vector.extract_strided_slice %4 {offsets = [0, 0], sizes = [8, 32], strides = [1, 1]} : vector<8x96xf32> to vector<8x32xf32>
    %6 = vector.extract_strided_slice %4 {offsets = [0, 32], sizes = [8, 32], strides = [1, 1]} : vector<8x96xf32> to vector<8x32xf32>
    %7 = vector.extract_strided_slice %4 {offsets = [0, 64], sizes = [8, 32], strides = [1, 1]} : vector<8x96xf32> to vector<8x32xf32>
    %8 = arith.index_cast %arg0 : i32 to index
    %9 = memref.load %arg1[%8] : memref<2xi32, #tpu.memory_space<smem>>
    %10 = tpu.iota {dimensions = array<i32: 1>} : vector<8x8xi32>
    %11 = vector.broadcast %9 : i32 to vector<8x8xi32>
    %12 = arith.cmpi slt, %10, %11 : vector<8x8xi32>
    %13 = vector.extract_strided_slice %5 {offsets = [0, 0], sizes = [8, 8], strides = [1, 1]} : vector<8x32xf32> to vector<8x8xf32>
    %14 = arith.truncf %13 : vector<8x8xf32> to vector<8x8xbf16>
    %15 = vector.extract_strided_slice %6 {offsets = [0, 0], sizes = [8, 8], strides = [1, 1]} : vector<8x32xf32> to vector<8x8xf32>
    %16 = arith.truncf %15 : vector<8x8xf32> to vector<8x8xbf16>
    %17 = vector.extract_strided_slice %7 {offsets = [0, 0], sizes = [8, 8], strides = [1, 1]} : vector<8x32xf32> to vector<8x8xf32>
    %18 = arith.truncf %17 : vector<8x8xf32> to vector<8x8xbf16>
    %cst_4 = arith.constant dense<0.000000e+00> : vector<8x8xf32>
    %19 = tpu.matmul %14, %16, %cst_4 {dimension_numbers = #tpu.dot_dimension_numbers<[1], [1], [0], [0], [0, 0, 1, 0], [], []>} : vector<8x8xbf16>, vector<8x8xbf16>, vector<8x8xf32> -> vector<8x8xf32>
    %cst_5 = arith.constant 0.353553385 : f32
    %20 = vector.broadcast %cst_5 : f32 to vector<8x8xf32>
    %21 = arith.mulf %19, %20 : vector<8x8xf32>
    %cst_6 = arith.constant -1.000000e+06 : f32
    %22 = vector.broadcast %cst_6 : f32 to vector<8x8xf32>
    %23 = arith.select %12, %21, %22 : vector<8x8xi1>, vector<8x8xf32>
    %cst_7 = arith.constant dense<0xFF800000> : vector<8xf32>
    %24 = vector.multi_reduction <maximumf>, %23, %cst_7 [1] : vector<8x8xf32> to vector<8xf32>
    %25 = vector.shape_cast %24 : vector<8xf32> to vector<8x1xf32>
    %26 = vector.broadcast %25 : vector<8x1xf32> to vector<8x8xf32>
    %27 = arith.subf %23, %26 : vector<8x8xf32>
    %28 = math.exp %27 : vector<8x8xf32>
    %cst_8 = arith.constant dense<0.000000e+00> : vector<8xf32>
    %29 = vector.multi_reduction <add>, %28, %cst_8 [1] : vector<8x8xf32> to vector<8xf32>
    %30 = vector.shape_cast %29 : vector<8xf32> to vector<8x1xf32>
    %31 = tpu.reciprocal %30 {approx = true} : vector<8x1xf32> -> vector<8x1xf32>
    %32 = vector.broadcast %31 : vector<8x1xf32> to vector<8x8xf32>
    %33 = arith.mulf %28, %32 : vector<8x8xf32>
    %34 = arith.truncf %33 : vector<8x8xf32> to vector<8x8xbf16>
    %cst_9 = arith.constant dense<0.000000e+00> : vector<8x8xf32>
    %35 = tpu.matmul %34, %18, %cst_9 {dimension_numbers = #tpu.dot_dimension_numbers<[1], [0], [0], [1], [0, 0, 1, 1], [], []>} : vector<8x8xbf16>, vector<8x8xbf16>, vector<8x8xf32> -> vector<8x8xf32>
    %36 = vector.extract_strided_slice %5 {offsets = [0, 8], sizes = [8, 8], strides = [1, 1]} : vector<8x32xf32> to vector<8x8xf32>
    %37 = arith.truncf %36 : vector<8x8xf32> to vector<8x8xbf16>
    %38 = vector.extract_strided_slice %6 {offsets = [0, 8], sizes = [8, 8], strides = [1, 1]} : vector<8x32xf32> to vector<8x8xf32>
    %39 = arith.truncf %38 : vector<8x8xf32> to vector<8x8xbf16>
    %40 = vector.extract_strided_slice %7 {offsets = [0, 8], sizes = [8, 8], strides = [1, 1]} : vector<8x32xf32> to vector<8x8xf32>
    %41 = arith.truncf %40 : vector<8x8xf32> to vector<8x8xbf16>
    %cst_10 = arith.constant dense<0.000000e+00> : vector<8x8xf32>
    %42 = tpu.matmul %37, %39, %cst_10 {dimension_numbers = #tpu.dot_dimension_numbers<[1], [1], [0], [0], [0, 0, 1, 0], [], []>} : vector<8x8xbf16>, vector<8x8xbf16>, vector<8x8xf32> -> vector<8x8xf32>
    %cst_11 = arith.constant 0.353553385 : f32
    %43 = vector.broadcast %cst_11 : f32 to vector<8x8xf32>
    %44 = arith.mulf %42, %43 : vector<8x8xf32>
    %cst_12 = arith.constant -1.000000e+06 : f32
    %45 = vector.broadcast %cst_12 : f32 to vector<8x8xf32>
    %46 = arith.select %12, %44, %45 : vector<8x8xi1>, vector<8x8xf32>
    %cst_13 = arith.constant dense<0xFF800000> : vector<8xf32>
    %47 = vector.multi_reduction <maximumf>, %46, %cst_13 [1] : vector<8x8xf32> to vector<8xf32>
    %48 = vector.shape_cast %47 : vector<8xf32> to vector<8x1xf32>
    %49 = vector.broadcast %48 : vector<8x1xf32> to vector<8x8xf32>
    %50 = arith.subf %46, %49 : vector<8x8xf32>
    %51 = math.exp %50 : vector<8x8xf32>
    %cst_14 = arith.constant dense<0.000000e+00> : vector<8xf32>
    %52 = vector.multi_reduction <add>, %51, %cst_14 [1] : vector<8x8xf32> to vector<8xf32>
    %53 = vector.shape_cast %52 : vector<8xf32> to vector<8x1xf32>
    %54 = tpu.reciprocal %53 {approx = true} : vector<8x1xf32> -> vector<8x1xf32>
    %55 = vector.broadcast %54 : vector<8x1xf32> to vector<8x8xf32>
    %56 = arith.mulf %51, %55 : vector<8x8xf32>
    %57 = arith.truncf %56 : vector<8x8xf32> to vector<8x8xbf16>
    %cst_15 = arith.constant dense<0.000000e+00> : vector<8x8xf32>
    %58 = tpu.matmul %57, %41, %cst_15 {dimension_numbers = #tpu.dot_dimension_numbers<[1], [0], [0], [1], [0, 0, 1, 1], [], []>} : vector<8x8xbf16>, vector<8x8xbf16>, vector<8x8xf32> -> vector<8x8xf32>
    %59 = vector.extract_strided_slice %5 {offsets = [0, 16], sizes = [8, 8], strides = [1, 1]} : vector<8x32xf32> to vector<8x8xf32>
    %60 = arith.truncf %59 : vector<8x8xf32> to vector<8x8xbf16>
    %61 = vector.extract_strided_slice %6 {offsets = [0, 16], sizes = [8, 8], strides = [1, 1]} : vector<8x32xf32> to vector<8x8xf32>
    %62 = arith.truncf %61 : vector<8x8xf32> to vector<8x8xbf16>
    %63 = vector.extract_strided_slice %7 {offsets = [0, 16], sizes = [8, 8], strides = [1, 1]} : vector<8x32xf32> to vector<8x8xf32>
    %64 = arith.truncf %63 : vector<8x8xf32> to vector<8x8xbf16>
    %cst_16 = arith.constant dense<0.000000e+00> : vector<8x8xf32>
    %65 = tpu.matmul %60, %62, %cst_16 {dimension_numbers = #tpu.dot_dimension_numbers<[1], [1], [0], [0], [0, 0, 1, 0], [], []>} : vector<8x8xbf16>, vector<8x8xbf16>, vector<8x8xf32> -> vector<8x8xf32>
    %cst_17 = arith.constant 0.353553385 : f32
    %66 = vector.broadcast %cst_17 : f32 to vector<8x8xf32>
    %67 = arith.mulf %65, %66 : vector<8x8xf32>
    %cst_18 = arith.constant -1.000000e+06 : f32
    %68 = vector.broadcast %cst_18 : f32 to vector<8x8xf32>
    %69 = arith.select %12, %67, %68 : vector<8x8xi1>, vector<8x8xf32>
    %cst_19 = arith.constant dense<0xFF800000> : vector<8xf32>
    %70 = vector.multi_reduction <maximumf>, %69, %cst_19 [1] : vector<8x8xf32> to vector<8xf32>
    %71 = vector.shape_cast %70 : vector<8xf32> to vector<8x1xf32>
    %72 = vector.broadcast %71 : vector<8x1xf32> to vector<8x8xf32>
    %73 = arith.subf %69, %72 : vector<8x8xf32>
    %74 = math.exp %73 : vector<8x8xf32>
    %cst_20 = arith.constant dense<0.000000e+00> : vector<8xf32>
    %75 = vector.multi_reduction <add>, %74, %cst_20 [1] : vector<8x8xf32> to vector<8xf32>
    %76 = vector.shape_cast %75 : vector<8xf32> to vector<8x1xf32>
    %77 = tpu.reciprocal %76 {approx = true} : vector<8x1xf32> -> vector<8x1xf32>
    %78 = vector.broadcast %77 : vector<8x1xf32> to vector<8x8xf32>
    %79 = arith.mulf %74, %78 : vector<8x8xf32>
    %80 = arith.truncf %79 : vector<8x8xf32> to vector<8x8xbf16>
    %cst_21 = arith.constant dense<0.000000e+00> : vector<8x8xf32>
    %81 = tpu.matmul %80, %64, %cst_21 {dimension_numbers = #tpu.dot_dimension_numbers<[1], [0], [0], [1], [0, 0, 1, 1], [], []>} : vector<8x8xbf16>, vector<8x8xbf16>, vector<8x8xf32> -> vector<8x8xf32>
    %82 = vector.extract_strided_slice %5 {offsets = [0, 24], sizes = [8, 8], strides = [1, 1]} : vector<8x32xf32> to vector<8x8xf32>
    %83 = arith.truncf %82 : vector<8x8xf32> to vector<8x8xbf16>
    %84 = vector.extract_strided_slice %6 {offsets = [0, 24], sizes = [8, 8], strides = [1, 1]} : vector<8x32xf32> to vector<8x8xf32>
    %85 = arith.truncf %84 : vector<8x8xf32> to vector<8x8xbf16>
    %86 = vector.extract_strided_slice %7 {offsets = [0, 24], sizes = [8, 8], strides = [1, 1]} : vector<8x32xf32> to vector<8x8xf32>
    %87 = arith.truncf %86 : vector<8x8xf32> to vector<8x8xbf16>
    %cst_22 = arith.constant dense<0.000000e+00> : vector<8x8xf32>
    %88 = tpu.matmul %83, %85, %cst_22 {dimension_numbers = #tpu.dot_dimension_numbers<[1], [1], [0], [0], [0, 0, 1, 0], [], []>} : vector<8x8xbf16>, vector<8x8xbf16>, vector<8x8xf32> -> vector<8x8xf32>
    %cst_23 = arith.constant 0.353553385 : f32
    %89 = vector.broadcast %cst_23 : f32 to vector<8x8xf32>
    %90 = arith.mulf %88, %89 : vector<8x8xf32>
    %cst_24 = arith.constant -1.000000e+06 : f32
    %91 = vector.broadcast %cst_24 : f32 to vector<8x8xf32>
    %92 = arith.select %12, %90, %91 : vector<8x8xi1>, vector<8x8xf32>
    %cst_25 = arith.constant dense<0xFF800000> : vector<8xf32>
    %93 = vector.multi_reduction <maximumf>, %92, %cst_25 [1] : vector<8x8xf32> to vector<8xf32>
    %94 = vector.shape_cast %93 : vector<8xf32> to vector<8x1xf32>
    %95 = vector.broadcast %94 : vector<8x1xf32> to vector<8x8xf32>
    %96 = arith.subf %92, %95 : vector<8x8xf32>
    %97 = math.exp %96 : vector<8x8xf32>
    %cst_26 = arith.constant dense<0.000000e+00> : vector<8xf32>
    %98 = vector.multi_reduction <add>, %97, %cst_26 [1] : vector<8x8xf32> to vector<8xf32>
    %99 = vector.shape_cast %98 : vector<8xf32> to vector<8x1xf32>
    %100 = tpu.reciprocal %99 {approx = true} : vector<8x1xf32> -> vector<8x1xf32>
    %101 = vector.broadcast %100 : vector<8x1xf32> to vector<8x8xf32>
    %102 = arith.mulf %97, %101 : vector<8x8xf32>
    %103 = arith.truncf %102 : vector<8x8xf32> to vector<8x8xbf16>
    %cst_27 = arith.constant dense<0.000000e+00> : vector<8x8xf32>
    %104 = tpu.matmul %103, %87, %cst_27 {dimension_numbers = #tpu.dot_dimension_numbers<[1], [0], [0], [1], [0, 0, 1, 1], [], []>} : vector<8x8xbf16>, vector<8x8xbf16>, vector<8x8xf32> -> vector<8x8xf32>
    %105 = tpu.concatenate %35, %58, %81, %104 in 1 : vector<8x8xf32>, vector<8x8xf32>, vector<8x8xf32>, vector<8x8xf32> -> vector<8x32xf32>
    %106 = arith.truncf %105 : vector<8x32xf32> to vector<8x32xbf16>
    %c0_28 = arith.constant 0 : index
    %c0_29 = arith.constant 0 : index
    %107 = vector.load %arg4[%c0_28, %c0_29] : memref<32x32xbf16, #tpu.memory_space<vmem>>, vector<32x32xbf16>
    %cst_30 = arith.constant dense<0.000000e+00> : vector<8x32xf32>
    %108 = tpu.matmul %106, %107, %cst_30 {dimension_numbers = #tpu.dot_dimension_numbers<[1], [0], [0], [1], [0, 0, 1, 1], [], []>} : vector<8x32xbf16>, vector<32x32xbf16>, vector<8x32xf32> -> vector<8x32xf32>
    %109 = arith.addf %1, %108 : vector<8x32xf32>
    %c0_31 = arith.constant 0 : index
    %c0_32 = arith.constant 0 : index
    %110 = vector.load %arg5[%c0_31, %c0_32] : memref<1x32xf32, #tpu.memory_space<vmem>>, vector<1x32xf32>
    %c0_33 = arith.constant 0 : index
    %c0_34 = arith.constant 0 : index
    %111 = vector.load %arg6[%c0_33, %c0_34] : memref<1x32xf32, #tpu.memory_space<vmem>>, vector<1x32xf32>
    %cst_35 = arith.constant dense<0.000000e+00> : vector<8xf32>
    %112 = vector.multi_reduction <add>, %109, %cst_35 [1] : vector<8x32xf32> to vector<8xf32>
    %113 = vector.shape_cast %112 : vector<8xf32> to vector<8x1xf32>
    %cst_36 = arith.constant 3.200000e+01 : f32
    %114 = vector.broadcast %cst_36 : f32 to vector<8x1xf32>
    %115 = arith.divf %113, %114 : vector<8x1xf32>
    %116 = vector.broadcast %115 : vector<8x1xf32> to vector<8x32xf32>
    %117 = arith.subf %109, %116 : vector<8x32xf32>
    %118 = arith.mulf %117, %117 : vector<8x32xf32>
    %cst_37 = arith.constant dense<0.000000e+00> : vector<8xf32>
    %119 = vector.multi_reduction <add>, %118, %cst_37 [1] : vector<8x32xf32> to vector<8xf32>
    %120 = vector.shape_cast %119 : vector<8xf32> to vector<8x1xf32>
    %cst_38 = arith.constant 3.200000e+01 : f32
    %121 = vector.broadcast %cst_38 : f32 to vector<8x1xf32>
    %122 = arith.divf %120, %121 : vector<8x1xf32>
    %123 = vector.broadcast %115 : vector<8x1xf32> to vector<8x32xf32>
    %124 = arith.subf %109, %123 : vector<8x32xf32>
    %cst_39 = arith.constant 9.99999974E-6 : f32
    %125 = vector.broadcast %cst_39 : f32 to vector<8x1xf32>
    %126 = arith.addf %122, %125 : vector<8x1xf32>
    %127 = math.rsqrt %126 : vector<8x1xf32>
    %128 = vector.broadcast %127 : vector<8x1xf32> to vector<8x32xf32>
    %129 = arith.mulf %124, %128 : vector<8x32xf32>
    %130 = vector.broadcast %110 : vector<1x32xf32> to vector<8x32xf32>
    %131 = arith.mulf %129, %130 : vector<8x32xf32>
    %132 = vector.broadcast %111 : vector<1x32xf32> to vector<8x32xf32>
    %133 = arith.addf %131, %132 : vector<8x32xf32>
    %134 = arith.truncf %133 : vector<8x32xf32> to vector<8x32xbf16>
    %c0_40 = arith.constant 0 : index
    %c0_41 = arith.constant 0 : index
    %135 = vector.load %arg7[%c0_40, %c0_41] : memref<32x64xbf16, #tpu.memory_space<vmem>>, vector<32x64xbf16>
    %cst_42 = arith.constant dense<0.000000e+00> : vector<8x64xf32>
    %136 = tpu.matmul %134, %135, %cst_42 {dimension_numbers = #tpu.dot_dimension_numbers<[1], [0], [0], [1], [0, 0, 1, 1], [], []>} : vector<8x32xbf16>, vector<32x64xbf16>, vector<8x64xf32> -> vector<8x64xf32>
    %c0_43 = arith.constant 0 : index
    %c0_44 = arith.constant 0 : index
    %137 = vector.load %arg8[%c0_43, %c0_44] : memref<1x64xf32, #tpu.memory_space<vmem>>, vector<1x64xf32>
    %138 = vector.broadcast %137 : vector<1x64xf32> to vector<8x64xf32>
    %139 = arith.addf %136, %138 : vector<8x64xf32>
    %cst_45 = arith.constant 0.000000e+00 : f32
    %140 = vector.broadcast %cst_45 : f32 to vector<8x64xf32>
    %141 = arith.cmpf ogt, %139, %140 : vector<8x64xf32>
    %cst_46 = arith.constant 0.00999999977 : f32
    %142 = vector.broadcast %cst_46 : f32 to vector<8x64xf32>
    %143 = arith.mulf %142, %139 : vector<8x64xf32>
    %144 = arith.select %141, %139, %143 : vector<8x64xi1>, vector<8x64xf32>
    %145 = arith.truncf %144 : vector<8x64xf32> to vector<8x64xbf16>
    %c0_47 = arith.constant 0 : index
    %c0_48 = arith.constant 0 : index
    %146 = vector.load %arg9[%c0_47, %c0_48] : memref<64x32xbf16, #tpu.memory_space<vmem>>, vector<64x32xbf16>
    %cst_49 = arith.constant dense<0.000000e+00> : vector<8x32xf32>
    %147 = tpu.matmul %145, %146, %cst_49 {dimension_numbers = #tpu.dot_dimension_numbers<[1], [0], [0], [1], [0, 0, 1, 1], [], []>} : vector<8x64xbf16>, vector<64x32xbf16>, vector<8x32xf32> -> vector<8x32xf32>
    %c0_50 = arith.constant 0 : index
    %c0_51 = arith.constant 0 : index
    %148 = vector.load %arg10[%c0_50, %c0_51] : memref<1x32xf32, #tpu.memory_space<vmem>>, vector<1x32xf32>
    %149 = vector.broadcast %148 : vector<1x32xf32> to vector<8x32xf32>
    %150 = arith.addf %147, %149 : vector<8x32xf32>
    %151 = arith.addf %133, %150 : vector<8x32xf32>
    %c0_52 = arith.constant 0 : index
    %c0_53 = arith.constant 0 : index
    %152 = vector.load %arg11[%c0_52, %c0_53] : memref<1x32xf32, #tpu.memory_space<vmem>>, vector<1x32xf32>
    %c0_54 = arith.constant 0 : index
    %c0_55 = arith.constant 0 : index
    %153 = vector.load %arg12[%c0_54, %c0_55] : memref<1x32xf32, #tpu.memory_space<vmem>>, vector<1x32xf32>
    %cst_56 = arith.constant dense<0.000000e+00> : vector<8xf32>
    %154 = vector.multi_reduction <add>, %151, %cst_56 [1] : vector<8x32xf32> to vector<8xf32>
    %155 = vector.shape_cast %154 : vector<8xf32> to vector<8x1xf32>
    %cst_57 = arith.constant 3.200000e+01 : f32
    %156 = vector.broadcast %cst_57 : f32 to vector<8x1xf32>
    %157 = arith.divf %155, %156 : vector<8x1xf32>
    %158 = vector.broadcast %157 : vector<8x1xf32> to vector<8x32xf32>
    %159 = arith.subf %151, %158 : vector<8x32xf32>
    %160 = arith.mulf %159, %159 : vector<8x32xf32>
    %cst_58 = arith.constant dense<0.000000e+00> : vector<8xf32>
    %161 = vector.multi_reduction <add>, %160, %cst_58 [1] : vector<8x32xf32> to vector<8xf32>
    %162 = vector.shape_cast %161 : vector<8xf32> to vector<8x1xf32>
    %cst_59 = arith.constant 3.200000e+01 : f32
    %163 = vector.broadcast %cst_59 : f32 to vector<8x1xf32>
    %164 = arith.divf %162, %163 : vector<8x1xf32>
    %165 = vector.broadcast %157 : vector<8x1xf32> to vector<8x32xf32>
    %166 = arith.subf %151, %165 : vector<8x32xf32>
    %cst_60 = arith.constant 9.99999974E-6 : f32
    %167 = vector.broadcast %cst_60 : f32 to vector<8x1xf32>
    %168 = arith.addf %164, %167 : vector<8x1xf32>
    %169 = math.rsqrt %168 : vector<8x1xf32>
    %170 = vector.broadcast %169 : vector<8x1xf32> to vector<8x32xf32>
    %171 = arith.mulf %166, %170 : vector<8x32xf32>
    %172 = vector.broadcast %152 : vector<1x32xf32> to vector<8x32xf32>
    %173 = arith.mulf %171, %172 : vector<8x32xf32>
    %174 = vector.broadcast %153 : vector<1x32xf32> to vector<8x32xf32>
    %175 = arith.addf %173, %174 : vector<8x32xf32>
    %c0_61 = arith.constant 0 : index
    %c0_62 = arith.constant 0 : index
    %c0_63 = arith.constant 0 : index
    %176 = vector.load %arg13[%c0_61, %c0_62, %c0_63] : memref<1x8x32xf32, #tpu.memory_space<vmem>>, vector<1x8x32xf32>
    %177 = vector.shape_cast %176 : vector<1x8x32xf32> to vector<8x32xf32>
    %178 = vector.shape_cast %175 : vector<8x32xf32> to vector<1x8x32xf32>
    tpu.vector_store %arg13[%c0_61, %c0_62, %c0_63], %178 {strides = array<i32>} : memref<1x8x32xf32, #tpu.memory_space<vmem>>, vector<1x8x32xf32>,
    return
  }
  func.func @transform_0(%arg0: i32, %arg1: memref<2xi32, #tpu.memory_space<smem>>) -> (i32, i32, i32) {
    %c0_i32 = arith.constant 0 : i32
    %c0_i32_0 = arith.constant 0 : i32
    %c0_i32_1 = arith.constant 0 : i32
    return %arg0, %c0_i32, %c0_i32_0 : i32, i32, i32
  }
  func.func @transform_1(%arg0: i32, %arg1: memref<2xi32, #tpu.memory_space<smem>>) -> (i32, i32) {
    %c0_i32 = arith.constant 0 : i32
    %c0_i32_0 = arith.constant 0 : i32
    %c0_i32_1 = arith.constant 0 : i32
    return %c0_i32, %c0_i32_0 : i32, i32
  }
  func.func @transform_2(%arg0: i32, %arg1: memref<2xi32, #tpu.memory_space<smem>>) -> (i32, i32) {
    %c0_i32 = arith.constant 0 : i32
    %c0_i32_0 = arith.constant 0 : i32
    %c0_i32_1 = arith.constant 0 : i32
    return %c0_i32, %c0_i32_0 : i32, i32
  }
  func.func @transform_3(%arg0: i32, %arg1: memref<2xi32, #tpu.memory_space<smem>>) -> (i32, i32) {
    %c0_i32 = arith.constant 0 : i32
    %c0_i32_0 = arith.constant 0 : i32
    %c0_i32_1 = arith.constant 0 : i32
    return %c0_i32, %c0_i32_0 : i32, i32
  }
  func.func @transform_4(%arg0: i32, %arg1: memref<2xi32, #tpu.memory_space<smem>>) -> (i32, i32) {
    %c0_i32 = arith.constant 0 : i32
    %c0_i32_0 = arith.constant 0 : i32
    %c0_i32_1 = arith.constant 0 : i32
    return %c0_i32, %c0_i32_0 : i32, i32
  }
  func.func @transform_5(%arg0: i32, %arg1: memref<2xi32, #tpu.memory_space<smem>>) -> (i32, i32) {
    %c0_i32 = arith.constant 0 : i32
    %c0_i32_0 = arith.constant 0 : i32
    %c0_i32_1 = arith.constant 0 : i32
    return %c0_i32, %c0_i32_0 : i32, i32
  }
  func.func @transform_6(%arg0: i32, %arg1: memref<2xi32, #tpu.memory_space<smem>>) -> (i32, i32) {
    %c0_i32 = arith.constant 0 : i32
    %c0_i32_0 = arith.constant 0 : i32
    %c0_i32_1 = arith.constant 0 : i32
    return %c0_i32, %c0_i32_0 : i32, i32
  }
  func.func @transform_7(%arg0: i32, %arg1: memref<2xi32, #tpu.memory_space<smem>>) -> (i32, i32) {
    %c0_i32 = arith.constant 0 : i32
    %c0_i32_0 = arith.constant 0 : i32
    %c0_i32_1 = arith.constant 0 : i32
    return %c0_i32, %c0_i32_0 : i32, i32
  }
  func.func @transform_8(%arg0: i32, %arg1: memref<2xi32, #tpu.memory_space<smem>>) -> (i32, i32) {
    %c0_i32 = arith.constant 0 : i32
    %c0_i32_0 = arith.constant 0 : i32
    %c0_i32_1 = arith.constant 0 : i32
    return %c0_i32, %c0_i32_0 : i32, i32
  }
  func.func @transform_9(%arg0: i32, %arg1: memref<2xi32, #tpu.memory_space<smem>>) -> (i32, i32) {
    %c0_i32 = arith.constant 0 : i32
    %c0_i32_0 = arith.constant 0 : i32
    %c0_i32_1 = arith.constant 0 : i32
    return %c0_i32, %c0_i32_0 : i32, i32
  }
  func.func @transform_10(%arg0: i32, %arg1: memref<2xi32, #tpu.memory_space<smem>>) -> (i32, i32) {
    %c0_i32 = arith.constant 0 : i32
    %c0_i32_0 = arith.constant 0 : i32
    %c0_i32_1 = arith.constant 0 : i32
    return %c0_i32, %c0_i32_0 : i32, i32
  }
  func.func @transform_11(%arg0: i32, %arg1: memref<2xi32, #tpu.memory_space<smem>>) -> (i32, i32, i32) {
    %c0_i32 = arith.constant 0 : i32
    %c0_i32_0 = arith.constant 0 : i32
    %c0_i32_1 = arith.constant 0 : i32
    return %arg0, %c0_i32, %c0_i32_0 : i32, i32, i32
  }
}

</mosaic_0001>

<bundles_post_ra>
// kernel: tpu_custom_call.1
= control target key start
LH: loop header
LB: loop body
LE: loop exit
PB: predicated region body
PF: predicated region fallthrough
CT: control target
= control target key end

     0   :  { %s2041_s0 = inlined_call_operand.hbm [shape: s32[2], index: 0, kind: input, shape index: {}]   ;;  %s2042_s1 = inlined_call_operand.vmem [shape: f32[2,8,32], index: 1, kind: input, shape index: {}]   ;;  %s2043_s2 = inlined_call_operand.vmem [shape: bf16[32,96], index: 2, kind: input, shape index: {}]   ;;  %s2044_s3 = inlined_call_operand.vmem [shape: bf16[32,32], index: 3, kind: input, shape index: {}]   ;;  %s2045_s4 = inlined_call_operand.vmem [shape: f32[1,32], index: 4, kind: input, shape index: {}]   ;;  %s2046_s5 = inlined_call_operand.vmem [shape: f32[1,32], index: 5, kind: input, shape index: {}]   ;;  %s2047_s6 = inlined_call_operand.hbm [shape: bf16[32,64], index: 6, kind: input, shape index: {}]   ;;  %s2048_s7 = inlined_call_operand.vmem [shape: f32[1,64], index: 7, kind: input, shape index: {}]   ;;  %s2049_s8 = inlined_call_operand.vmem [shape: bf16[64,32], index: 8, kind: input, shape index: {}]   ;;  %s2050_s9 = inlined_call_operand.vmem [shape: f32[1,32], index: 9, kind: input, shape index: {}]   ;;  %s2051_s10 = inlined_call_operand.vmem [shape: f32[1,32], index: 10, kind: input, shape index: {}]   ;;  %s2052_s11 = inlined_call_operand.vmem [shape: f32[1,32], index: 11, kind: input, shape index: {}]   ;;  %s2053_s12 = inlined_call_operand.hbm [shape: f32[2,8,32], index: 12, kind: output, shape index: {}]  }
   0x1   :  { %2057 = sst [smem:[#allocation12_spill]] %s2042_s1  ;;  %s1551_s23 = scalar_lea.hbm %s2041_s0, 16 }
   0x2   :  { %p1552_p0 = scmp.ne.s32.totalorder %s2041_s0, %s1551_s23  ;;  %p1555_p1 = scmp.lt.u32.totalorder %s1551_s23, %s2041_s0 }
   0x4   :  { %p1557_p2 = pnand %p1555_p1, %p1552_p0 }
   0x6   :  { %1560 = shalt.err (!%p1557_p2)  }
   0x7   :  { %s1659_s28 = smov [#allocation3]  }
   0x8   :  { %18 = dma.hbm_to_smem %s2041_s0, 16, %s1659_s28, [#allocation2] }
   0x9   :  { %1633 = dma.done.wait [#allocation2], 16 }
   0xa   :  { %1634 = vsyncadd [#allocation2], 4294967280 }
   0xb   :  { %20 = sfence }
   0xc   :  { %21 = vsyncpa [#allocation5], 0 }
   0xd   :  { %22 = vsyncpa [#allocation6], 0 }
   0xe   :  { %24 = vsyncpa [#allocation6 + $0x1], 0  ;;  %s1757_s13 = smov 0   ;;  %s1759_s14 = smov 0  }
   0xf   :  { %s1761_s15 = smov 0   ;;  %s1763_s16 = smov 0  }
  0x10 LB: > { %s1778_s0 = sadd.s32 4294967295, %s1657_s16   ;;  %s1298_s17 = sadd.s32 4294967294, %s1657_s16   ;;  %s1657_s16 = sphi %s1763_s16, %s2075_s16   ;;  %s1653_s15 = sphi %s1761_s15, %s2074_s15   ;;  %s1649_s14 = sphi %s1759_s14, %s2073_s14   ;;  %s1645_s13 = sphi %s1757_s13, %s2072_s13  }
  0x11   : > { %s1782_s18 = sadd.s32 1, %s1657_s16   ;;  %s273_s19 = sadd.s32 1, %s1653_s15 }
  0x12   : > { %s270_s20 = ssub.s32 %s1657_s16, %s1782_s18  ;;  %p283_p3 = scmp.ne.s32.totalorder %s1653_s15, %s1649_s14 }
  0x13   : > { %p271_p4 = scmp.eq.s32.totalorder %s270_s20, 0  ;;  %p284_p5 = scmp.eq.s32.totalorder %s1778_s0, 1 }
  0x14   : > { %p289_p6 = scmp.ne.s32.totalorder %s1649_s14, %s1645_s13  ;;  %p290_p7 = scmp.eq.s32.totalorder %s1298_s17, 1 }
  0x15   : > { %s1793_s21 = scalar_select %p271_p4, %s1653_s15, %s273_s19  }
  0x16   : > { %p1795_p8 = por %p284_p5, %p283_p3  ;;  %p1799_p9 = por %p290_p7, %p289_p6 }
  0x17   : > { %2058 = sst [smem:[#allocation11_spill]] %s1793_s21  ;;  %p1299_p10 = scmp.ge.s32.totalorder %s1657_s16, 1 }
  0x18   : > { %s2059_s22 = scalar_select %p1795_p8, 1, 0 }
  0x19   : > { %s2060_s23 = scalar_select %p1799_p9, 1, 0 }
  0x1a   : > { %p297_p11 = scmp.lt.s32.totalorder %s1657_s16, 3  ;;  %p2054_p12 = scmp.eq.s32.totalorder %s1778_s0, 0 }
  0x1b   : > { %s1660_s25 = smov [#allocation4]   ;;  %s1561_s30 = scalar_lea.hbm %s2047_s6, 256 }
  0x1c   : > { %p1806_p13 = pnand %p1299_p10, %p297_p11  ;;  %s321_s26 = sshll.u32 %s1660_s25, 4  ;;  %s322_s26 = int_to_ptr.vmem [resolvable:$true] %s321_s26 }
  0x1d   : > { %p1562_p2 = scmp.ne.s32.totalorder %s2047_s6, %s1561_s30  ;;  %p1568_p6 = scmp.lt.u32.totalorder %s1561_s30, %s2047_s6 }
  0x1e   : > { %s2061_s24 = scalar_select %p1806_p13, 1, 0 }
  0x1f   : > { %p1458_p0 = pneg %p1806_p13 }
  0x21   : > { %p1814_p1 = pnand %p2054_p12, %p1458_p0 }
  0x23   : > { %p1563_p3 = pneg %p1814_p1 }
  0x25   : > { %p1564_p4 = pnand %p1563_p3, %p1562_p2 }
  0x27   : > { %p1565_p5 = pneg %p1564_p4 }
  0x29   : > { %p1570_p7 = pnand %p1568_p6, %p1565_p5 }
  0x2b   : > { %1573 = shalt.err (!%p1570_p7)
}
  0x2c   : > { %s1574_s21 = scalar_lea.vmem %s322_s26, 256  ;;  %p1582_p12 = scmp.lt.s32.totalorder %s322_s26, %s322_s26 }
  0x2d   : > { %p1575_p10 = scmp.ne.s32.totalorder %s322_s26, %s1574_s21  ;;  %p1583_p9 = scmp.lt.s32.totalorder %s1574_s21, %s1574_s21 }
  0x2f   : > { %p1577_p11 = pnand %p1575_p10, %p1563_p3  ;;  %p1584_p8 = por %p1583_p9, %p1582_p12 }
  0x31   : > { %p1578_p0 = pneg %p1577_p11 }
  0x33   : > { %p1585_p13 = pnand %p1584_p8, %p1578_p0 }
  0x35   : > { %1588 = shalt.err (!%p1585_p13)
}
  0x36   : > { %s1661_s28 = smov 64   ;;  %s1662_s29 = smov 4  }
  0x37   : > { %1461 = dma.hbm_to_vmem [thread:$0]  (!%p1814_p1), %s2047_s6, 256, %s322_s26, [#allocation5], %s1661_s28, %s1661_s28, %s1662_s29  }
  0x38   : > { %p2063_p2 = scmp.ne.s32.totalorder %s2061_s24, 0 }
  0x39   : > { %p2064_p4 = scmp.eq.s32.totalorder (!%p2063_p2), %s1778_s0, 0 }
  0x3a   : > { %359 = sbr.rel (%p2063_p2) target bundleno = 2627 (0xa43), region = 64 }
  0x41   : > { %1636 = dma.done.wait (%p2064_p4), [#allocation5], 256   ;;  %p2065_p3 = pmov %p2064_p4 }
  0x42   : > { %p398_p8 = scmp.lt.s32.totalorder %s1778_s0, 1  ;;  %v1663_v0 = vmov 0.0   ;;  %vm1664_vm0 = vmmov 0   ;;  %s2066_s1 = sld [smem:[#allocation12_spill]]  ;;  %v1521_v1 = vld [vmem:[%s2043_s2] sm:$0xff]   ;;  %v1522_v2 = vld [vmem:[%s2043_s2 + $0x8] sm:$0xff]   ;;  %v466_v21 = vlaneseq }
  0x43   : > { %1638 = vsyncadd (%p2065_p3), [#allocation5], 4294967040  ;;  %1368 = vmatprep.subr.bf16.mxu0 %v1663_v0  ;;  %1372 = vmatprep.mubr.msk.bf16.mxu0 %vm1664_vm0, %v1663_v0  ;;  %vm421_vm1 = vcmask 261120   ;;  %s1665_s17 = smov 120   ;;  %s1666_s19 = smov 96   ;;  %vm474_vm2 = vcmask 64512  }
  0x44   : > { %s399_s21 = scalar_select %p398_p8, %s1778_s0, 1  ;;  %1376 = vmatprep.subr.bf16.mxu1 %v1663_v0  ;;  %1378 = vmatprep.mubr.msk.bf16.mxu1 %vm1664_vm0, %v1663_v0  ;;  %v467_v22 = vand.u32 127, %v466_v21  ;;  %vm540_vm4 = vcmask 1043456   ;;  %vm933_vm5 = vcmask 130048   ;;  %vm935_vm6 = vcmask 195584  }
  0x45   : > { %1369 = vmatpush3.bf16.msra.mxu0 %v1521_v1  ;;  %s1669_s26 = smov 72   ;;  %s1670_s27 = smov 112   ;;  %vm1138_vm8 = vcmask 523264  }
  0x46   : > { %s1305_s24 = sshll.u32 %s399_s21, 3  ;;  %1370 = vmatprep.subr.bf16.mxu0 %v1663_v0  ;;  %s1667_s21 = smov 80  }
  0x47   : > { %s465_s20 = sld [smem:[#allocation3 + %s1778_s0]]  ;;  %s1672_s25 = smov 56  }
  0x48   : > { %s401_s30 = scalar_lea.vmem %s2066_s1, %s1305_s24  ;;  %s1668_s24 = smov 88  }
  0x49   : > { %v1857_v3 = vld [vmem:[%s401_s30] sm:$0xff]  ;;  %1371 = vmatpush3.bf16.msra.mxu0 %v1522_v2  ;;  %s1671_s30 = smov 104   ;;  %s1673_s28 = smov 64  }
  0x4a   : > { %v404_v4 = vpack.c.bf16 %v1857_v3, %v1857_v3  ;;  %1382 = vmatprep.subr.bf16.mxu0 %v1663_v0  ;;  %s1674_s29 = smov 40   ;;  %p2069_p12 = scmp.ne.s32.totalorder %s2059_s22, 0 }
  0x4c   : > { %1373 = vmatmul.mubr.msk.bf16.vlgmr.msra.gmra.mrb[0].mxu0 %vm421_vm1, %v404_v4 }
  0x4d   : > { %1384 = vmatprep.mubr.msk.bf16.mxu0 %vm1664_vm0, %v1663_v0  ;;  %v468_v23 = vstv %s465_s20  ;;  %s1678_s20 = smov 24  }
  0x4e   : > { %vm1897_vm3 = vcmp.lt.s32.totalorder %v467_v22, %v468_v23 }
 0x11f   : > { %v459_v5 = vpop.f32.mrb[0].mxu0 }
 0x120   : > { %v1866_v6 = vpack.c.bf16 %v459_v5, %v459_v5  ;;  %v1374_v7 = vpop.f32.mrb[1].mxu0 }
 0x121   : > { %v462_v8 = vpop.f32.mrb[2].mxu0 }
 0x122   : > { %584 = vrot.lane.b32.xlu1 %v1866_v6, %s1665_s17  ;;  %472 = vrot.lane.b32.xlu0 %v1866_v6, %s1666_s19  ;;  %v1375_v9 = vpop.f32.mrb[3].mxu0  ;;  %s1675_s17 = smov 48   ;;  %s1676_s19 = smov 8  }
 0x126   : > { %698 = vrot.lane.b32.xlu1 %v1866_v6, %s1667_s21  ;;  %586 = vrot.lane.b32.xlu0 %v1866_v6, %s1668_s24  ;;  %s395_s21 = sand.u32 1, %s1649_s14  }
 0x127   : > { %s1304_s24 = sshll.u32 %s395_s21, 3 }
 0x12a   : > { %810 = vrot.lane.b32.xlu1 %v1866_v6, %s1669_s26  ;;  %696 = vrot.lane.b32.xlu0 %v1866_v6, %s1670_s27  ;;  %s1214_s26 = scalar_lea.sflag [#allocation6], %s395_s21 }
 0x12e   : > { %808 = vrot.lane.b32.xlu0 %v1866_v6, %s1671_s30  ;;  %s1677_s30 = smov 16  }
 0x194   : > { %v473_v10 = vpop.permute.xlu0 %472  ;;  %v585_v13 = vpop.permute.xlu1 %584 }
 0x195   : > { %v479_v11 = vsel %vm474_vm2, %v473_v10, 0 }
 0x196   : > { %1377 = vmatpush3.bf16.xpose.msra.mxu1 %v479_v11 }
 0x197   : > { %1388 = vmatprep.subr.bf16.mxu1 %v1663_v0 }
 0x198   : > { %v587_v12 = vpop.permute.xlu0 %586  ;;  %v699_v15 = vpop.permute.xlu1 %698 }
 0x199   : > { %v592_v14 = vsel %vm474_vm2, %v587_v12, 0  ;;  %v704_v16 = vsel %vm474_vm2, %v699_v15, 0 }
 0x19c   : > { %v811_v17 = vpop.permute.xlu1 %810  ;;  %v697_v18 = vpop.permute.xlu0 %696 }
 0x19d   : > { %1379 = vmatmul.mubr.msk.bf16.vlgmr.msra.gmra.mrb[0].mxu1 %vm474_vm2, %v1866_v6  ;;  %v816_v19 = vsel %vm474_vm2, %v811_v17, 0 }
 0x19e   : > { %1389 = vmatpush3.bf16.xpose.msra.mxu1 %v592_v14  ;;  %1390 = vmatprep.mubr.msk.bf16.mxu1 %vm1664_vm0, %v1663_v0 }
 0x19f   : > { %1400 = vmatprep.subr.bf16.mxu1 %v1663_v0 }
 0x1a0   : > { %v809_v20 = vpop.permute.xlu0 %808 }
 0x1a5   : > { %1391 = vmatmul.mubr.msk.bf16.vlgmr.msra.gmra.mrb[4].mxu1 %vm474_vm2, %v585_v13 }
 0x1a6   : > { %1401 = vmatpush3.bf16.xpose.msra.mxu1 %v704_v16  ;;  %1402 = vmatprep.mubr.msk.bf16.mxu1 %vm1664_vm0, %v1663_v0 }
 0x1a7   : > { %1412 = vmatprep.subr.bf16.mxu1 %v1663_v0 }
 0x1ad   : > { %1403 = vmatmul.mubr.msk.bf16.vlgmr.msra.gmra.mrb[8].mxu1 %vm474_vm2, %v697_v18 }
 0x1ae   : > { %1413 = vmatpush3.bf16.xpose.msra.mxu1 %v816_v19  ;;  %1414 = vmatprep.mubr.msk.bf16.mxu1 %vm1664_vm0, %v1663_v0 }
 0x1af   : > { %1424 = vmatprep.subr.bf16.mxu1 %v1663_v0 }
 0x1b5   : > { %1415 = vmatmul.mubr.msk.bf16.vlgmr.msra.gmra.mrb[12].mxu1 %vm474_vm2, %v809_v20 }
 0x1b6   : > { %1428 = vmatprep.mubr.msk.bf16.mxu1 %vm1664_vm0, %v1663_v0 }
 0x270   : > { %v515_v24 = vpop.f32.mrb[0].mxu1 }
 0x271   : > { %v521_v26 = vmul.f32 0.35355338, %v515_v24  ;;  %v1380_v27 = vpop.f32.mrb[1].mxu1 }
 0x272   : > { %v518_v28 = vpop.f32.mrb[2].mxu1 }
 0x273   : > { %v1381_v29 = vpop.f32.mrb[3].mxu1  ;;  %v522_v30 = vsel %vm1897_vm3, %v521_v26, -1000000.0 }
 0x274   : > { %v523_v31 = vsel %vm474_vm2, %v522_v30, -inf }
 0x275   : > { %524 = vmax.xlane.f32.xlu1 %v523_v31 }
 0x278   : > { %v628_v32 = vpop.f32.mrb[4].mxu1 }
 0x279   : > { %v634_v33 = vmul.f32 0.35355338, %v628_v32  ;;  %v1392_v34 = vpop.f32.mrb[5].mxu1 }
 0x27a   : > { %v631_v35 = vpop.f32.mrb[6].mxu1 }
 0x27b   : > { %v1393_v36 = vpop.f32.mrb[7].mxu1  ;;  %v635_v37 = vsel %vm1897_vm3, %v634_v33, -1000000.0 }
 0x27c   : > { %v636_v38 = vsel %vm474_vm2, %v635_v37, -inf }
 0x27d   : > { %637 = vmax.xlane.f32.xlu0 %v636_v38 }
 0x280   : > { %v740_v39 = vpop.f32.mrb[8].mxu1 }
 0x281   : > { %v746_v40 = vmul.f32 0.35355338, %v740_v39  ;;  %v1404_v41 = vpop.f32.mrb[9].mxu1 }
 0x282   : > { %v743_v42 = vpop.f32.mrb[10].mxu1 }
 0x283   : > { %v1405_v43 = vpop.f32.mrb[11].mxu1  ;;  %v747_v44 = vsel %vm1897_vm3, %v746_v40, -1000000.0 }
 0x284   : > { %v748_v45 = vsel %vm474_vm2, %v747_v44, -inf  ;;  %v1523_v43 = vld [vmem:[%s2044_s3] sm:$0xff]  }
 0x285   : > { %749 = vmax.xlane.f32.xlu0 %v748_v45  ;;  %1425 = vmatpush3.bf16.msra.mxu1 %v1523_v43 }
 0x286   : > { %1426 = vmatprep.subr.bf16.mxu1 %v1663_v0 }
 0x288   : > { %v852_v46 = vpop.f32.mrb[12].mxu1 }
 0x289   : > { %v858_v47 = vmul.f32 0.35355338, %v852_v46  ;;  %v1416_v48 = vpop.f32.mrb[13].mxu1 }
 0x28a   : > { %v855_v49 = vpop.f32.mrb[14].mxu1 }
 0x28b   : > { %v1417_v50 = vpop.f32.mrb[15].mxu1  ;;  %v859_v51 = vsel %vm1897_vm3, %v858_v47, -1000000.0 }
 0x28c   : > { %v860_v52 = vsel %vm474_vm2, %v859_v51, -inf }
 0x28d   : > { %861 = vmax.xlane.f32.xlu1 %v860_v52 }
 0x302   : > { %v525_v53 = vpop.xlane.xlu1 %524 }
 0x303   : > { %v526_v54 = vsub.f32 %v522_v30, %v525_v53 }
 0x305   : > { %v527_v55 = vmul.f32 1.442695, %v526_v54 }
 0x307   : > { %1531 = vpow2.f32 %v527_v55 }
 0x30a   : > { %v638_v56 = vpop.xlane.xlu0 %637 }
 0x30b   : > { %v639_v57 = vsub.f32 %v635_v37, %v638_v56 }
 0x30d   : > { %v640_v58 = vmul.f32 1.442695, %v639_v57 }
 0x30f   : > { %1533 = vpow2.f32 %v640_v58 }
 0x311   : > { %v1532_v59 = vpop.eup %1531 }
 0x312   : > { %v750_v60 = vpop.xlane.xlu0 %749  ;;  %v529_v61 = vsel %vm474_vm2, %v1532_v59, 0.0 }
 0x313   : > { %v751_v62 = vsub.f32 %v747_v44, %v750_v60  ;;  %530 = vadd.xlane.f32.xlu0 %v529_v61  ;;  %v1524_v44 = vld [vmem:[%s2044_s3 + $0x8] sm:$0xff]  }
 0x314   : > { %1427 = vmatpush3.bf16.msra.mxu1 %v1524_v44 }
 0x315   : > { %v752_v63 = vmul.f32 1.442695, %v751_v62  ;;  %1440 = vmatprep.subr.bf16.mxu1 %v1663_v0 }
 0x317   : > { %1535 = vpow2.f32 %v752_v63 }
 0x319   : > { %v1534_v1 = vpop.eup %1533 }
 0x31a   : > { %v642_v2 = vsel %vm474_vm2, %v1534_v1, 0.0  ;;  %v862_v7 = vpop.xlane.xlu1 %861 }
 0x31b   : > { %643 = vadd.xlane.f32.xlu1 %v642_v2  ;;  %v863_v8 = vsub.f32 %v859_v51, %v862_v7 }
 0x31d   : > { %v864_v9 = vmul.f32 1.442695, %v863_v8 }
 0x31f   : > { %1537 = vpow2.f32 %v864_v9 }
 0x321   : > { %v1536_v4 = vpop.eup %1535 }
 0x322   : > { %v754_v5 = vsel %vm474_vm2, %v1536_v4, 0.0 }
 0x323   : > { %755 = vadd.xlane.f32.xlu0 %v754_v5 }
 0x329   : > { %v1538_v10 = vpop.eup %1537 }
 0x32a   : > { %v866_v11 = vsel %vm474_vm2, %v1538_v10, 0.0 }
 0x32c   : > { %648 = vrot.lane.b32.xlu1 %v1866_v6, %s1672_s25  ;;  %s1335_s25 = sshll.u32 %s1778_s0, 7  ;;  %s1679_s0 = smov [#allocation7]  }
 0x32d   : > { %s1998_s1 = scalar_lea.hbm %s2053_s12, %s1335_s25 }
 0x339   : > { %535 = vrot.lane.b32.xlu0 %v1866_v6, %s1673_s28  ;;  %s397_s28 = scalar_lea.vmem [#allocation7], %s1304_s24  ;;  %s1593_s24 = sshll.u32 %s1679_s0, 4  ;;  %s1594_s24 = int_to_ptr.vmem [resolvable:$false] %s1593_s24 }
 0x33d   : > { %872 = vrot.lane.b32.xlu0 %v1866_v6, %s1674_s29  ;;  %s1227_s29 = sshll.u32 %s397_s28, 4  ;;  %s2000_s29 = int_to_ptr.vmem [resolvable:$true] %s1227_s29 }
 0x33e   : > { %s1589_s27 = scalar_lea.vmem %s2000_s29, 128  ;;  %p1596_p5 = scmp.lt.s32.totalorder %s2000_s29, %s1594_s24 }
 0x33f   : > { %p1590_p9 = scmp.ne.s32.totalorder %s2000_s29, %s1589_s27 }
 0x341   : > { %p1591_p13 = pnand %p1590_p9, %p2069_p12 }
 0x343   : > { %p1592_p1 = pneg %p1591_p13 }
 0x350   : > { %867 = vadd.xlane.f32.xlu1 %v866_v11  ;;  %v1526_v11 = vld [vmem:[#allocation4 + $0x8] sm:$0xff]  }
 0x361   : > { %760 = vrot.lane.b32.xlu1 %v1866_v6, %s1675_s17 }
 0x3a0   : > { %v531_v12 = vpop.xlane.xlu0 %530 }
 0x3a1   : > { %1539 = vrcp.f32 %v531_v12  ;;  %v1528_v12 = vld [vmem:[%s2049_s8 + $0x8] sm:$0xff]  }
 0x3a8   : > { %v644_v13 = vpop.xlane.xlu1 %643 }
 0x3a9   : > { %1541 = vrcp.f32 %v644_v13 }
 0x3ab   : > { %v1540_v14 = vpop.eup %1539 }
 0x3ac   : > { %v533_v16 = vmul.f32 %v1540_v14, %v1532_v59  ;;  %v649_v19 = vpop.permute.xlu1 %648 }
 0x3ad   : > { %v654_v22 = vsel %vm540_vm4, %v649_v19, 0  ;;  %v1321_v19 = vld [vmem:[%s2046_s5] ss:$0 sm:$0xff] }
 0x3ae   : > { %v534_v20 = vpack.c.bf16 %v533_v16, %v533_v16 }
 0x3b0   : > { %v756_v15 = vpop.xlane.xlu0 %755 }
 0x3b1   : > { %1543 = vrcp.f32 %v756_v15 }
 0x3b3   : > { %v1542_v21 = vpop.eup %1541 }
 0x3b4   : > { %v536_v17 = vpop.permute.xlu0 %535  ;;  %v646_v6 = vmul.f32 %v1542_v21, %v1534_v1 }
 0x3b5   : > { %v542_v18 = vsel %vm540_vm4, %v536_v17, 0  ;;  %v1320_v17 = vld [vmem:[%s2045_s4] ss:$0 sm:$0xff] }
 0x3b6   : > { %1383 = vmatpush3.bf16.msra.mxu0 %v542_v18  ;;  %v647_v23 = vpack.c.bf16 %v646_v6, %v646_v6  ;;  %v1529_v6 = vld [vmem:[%s2049_s8 + $0x10] sm:$0xff]  }
 0x3b7   : > { %1394 = vmatprep.subr.bf16.mxu0 %v1663_v0 }
 0x3b8   : > { %v873_v29 = vpop.permute.xlu0 %872 }
 0x3b9   : > { %1385 = vmatmul.mubr.msk.bf16.vlgmr.msra.gmra.mrb[4].mxu0 %vm474_vm2, %v534_v20  ;;  %v878_v31 = vsel %vm540_vm4, %v873_v29, 0 }
 0x3ba   : > { %1395 = vmatpush3.bf16.msra.mxu0 %v654_v22  ;;  %1396 = vmatprep.mubr.msk.bf16.mxu0 %vm1664_vm0, %v1663_v0 }
 0x3bb   : > { %1406 = vmatprep.subr.bf16.mxu0 %v1663_v0  ;;  %v1544_v24 = vpop.eup %1543 }
 0x3bc   : > { %v758_v26 = vmul.f32 %v1544_v24, %v1536_v4  ;;  %v1322_v24 = vld [vmem:[%s2048_s7] ss:$0 sm:$0xff] }
 0x3be   : > { %v759_v30 = vpack.c.bf16 %v758_v26, %v758_v26 }
 0x3c1   : > { %1397 = vmatmul.mubr.msk.bf16.vlgmr.msra.gmra.mrb[8].mxu0 %vm474_vm2, %v647_v23  ;;  %v1530_v23 = vld [vmem:[%s2049_s8 + $0x18] sm:$0xff]  }
 0x3c2   : > { %1408 = vmatprep.mubr.msk.bf16.mxu0 %vm1664_vm0, %v1663_v0 }
 0x3dd   : > { %v868_v25 = vpop.xlane.xlu1 %867 }
 0x3de   : > { %1545 = vrcp.f32 %v868_v25 }
 0x3e1   : > { %v761_v27 = vpop.permute.xlu1 %760 }
 0x3e2   : > { %v766_v28 = vsel %vm540_vm4, %v761_v27, 0 }
 0x3e3   : > { %1407 = vmatpush3.bf16.msra.mxu0 %v766_v28 }
 0x3e4   : > { %1418 = vmatprep.subr.bf16.mxu0 %v1663_v0 }
 0x3e6   : > { %1409 = vmatmul.mubr.msk.bf16.vlgmr.msra.gmra.mrb[12].mxu0 %vm474_vm2, %v759_v30 }
 0x3e7   : > { %1419 = vmatpush3.bf16.msra.mxu0 %v878_v31  ;;  %1420 = vmatprep.mubr.msk.bf16.mxu0 %vm1664_vm0, %v1663_v0 }
 0x3e8   : > { %v1546_v32 = vpop.eup %1545  ;;  %1432 = vmatprep.subr.bf16.mxu0 %v1663_v0 }
 0x3e9   : > { %v870_v33 = vmul.f32 %v1546_v32, %v1538_v10  ;;  %v1525_v10 = vld [vmem:[#allocation4] sm:$0xff]  }
 0x3eb   : > { %v871_v34 = vpack.c.bf16 %v870_v33, %v870_v33 }
 0x3ee   : > { %1421 = vmatmul.mubr.msk.bf16.vlgmr.msra.gmra.mrb[16].mxu0 %vm474_vm2, %v871_v34 }
 0x3ef   : > { %1436 = vmatprep.mubr.msk.bf16.mxu0 %vm1664_vm0, %v1663_v0  ;;  %1433 = vmatpush3.bf16.msra.mxu0 %v1525_v10 }
 0x3f0   : > { %1434 = vmatprep.subr.bf16.mxu0 %v1663_v0 }
 0x3f3   : > { %1435 = vmatpush3.bf16.msra.mxu0 %v1526_v11 }
 0x48c   : > { %v578_v35 = vpop.f32.mrb[4].mxu0 }
 0x48d   : > { %v1386_v36 = vpop.f32.mrb[5].mxu0 }
 0x48e   : > { %v581_v37 = vpop.f32.mrb[6].mxu0 }
 0x48f   : > { %v1387_v38 = vpop.f32.mrb[7].mxu0 }
 0x494   : > { %v690_v39 = vpop.f32.mrb[8].mxu0 }
 0x495   : > { %921 = vrot.lane.b32.xlu1 %v690_v39, %s1676_s19  ;;  %v1398_v40 = vpop.f32.mrb[9].mxu0 }
 0x496   : > { %v693_v41 = vpop.f32.mrb[10].mxu0 }
 0x497   : > { %v1399_v42 = vpop.f32.mrb[11].mxu0 }
 0x4b9   : > { %v802_v45 = vpop.f32.mrb[12].mxu0 }
 0x4ba   : > { %925 = vrot.lane.b32.xlu0 %v802_v45, %s1677_s30  ;;  %v1410_v46 = vpop.f32.mrb[13].mxu0  ;;  %s1595_s30 = scalar_lea.vmem %s1594_s24, 256 }
 0x4bb   : > { %v805_v47 = vpop.f32.mrb[14].mxu0  ;;  %p1597_p6 = scmp.lt.s32.totalorder %s1595_s30, %s1589_s27 }
 0x4bc   : > { %v1411_v48 = vpop.f32.mrb[15].mxu0 }
 0x4bd   : > { %p1598_p7 = por %p1597_p6, %p1596_p5 }
 0x4bf   : > { %p1599_p10 = pnand %p1598_p7, %p1592_p1 }
 0x4c1   : > { %v914_v49 = vpop.f32.mrb[16].mxu0 }
 0x4c2   : > { %929 = vrot.lane.b32.xlu1 %v914_v49, %s1678_s20  ;;  %v1422_v50 = vpop.f32.mrb[17].mxu0  ;;  %v1332_v49 = vld [vmem:[%s2051_s10] ss:$0 sm:$0xff] }
 0x4c3   : > { %v917_v51 = vpop.f32.mrb[18].mxu0 }
 0x4c4   : > { %v1423_v52 = vpop.f32.mrb[19].mxu0  ;;  %v1333_v51 = vld [vmem:[%s2052_s11] ss:$0 sm:$0xff] }
 0x507   : > { %v922_v53 = vpop.permute.xlu1 %921 }
 0x508   : > { %v932_v55 = vsel %vm474_vm2, %v578_v35, %v922_v53 }
 0x52c   : > { %v926_v54 = vpop.permute.xlu0 %925 }
 0x52d   : > { %v934_v56 = vsel %vm933_vm5, %v932_v55, %v926_v54 }
 0x534   : > { %v930_v57 = vpop.permute.xlu1 %929 }
 0x535   : > { %v936_v58 = vsel %vm935_vm6, %v934_v56, %v930_v57 }
 0x536   : > { %v937_v59 = vpack.c.bf16 %v936_v58, %v936_v58 }
 0x538   : > { %1429 = vmatmul.mubr.msk.bf16.vlgmr.msra.gmra.mrb[16].mxu1 %vm421_vm1, %v937_v59 }
 0x539   : > { %1448 = vmatprep.mubr.msk.bf16.mxu1 %vm1664_vm0, %v1663_v0 }
 0x60b   : > { %v991_v60 = vpop.f32.mrb[16].mxu1 }
 0x60c   : > { %v997_v61 = vadd.f32 %v991_v60, %v1857_v3  ;;  %v1430_v62 = vpop.f32.mrb[17].mxu1  ;;  %v1527_v3 = vld [vmem:[%s2049_s8] sm:$0xff]  }
 0x60d   : > { %v994_v63 = vpop.f32.mrb[18].mxu1  ;;  %1441 = vmatpush3.bf16.msra.mxu1 %v1527_v3 }
 0x60e   : > { %v1431_v1 = vpop.f32.mrb[19].mxu1  ;;  %v1000_v2 = vsel %vm421_vm1, %v997_v61, 0.0  ;;  %1442 = vmatprep.subr.bf16.mxu1 %v1663_v0 }
 0x60f   : > { %1001 = vadd.xlane.f32.xlu0 %v1000_v2 }
 0x611   : > { %1443 = vmatpush3.bf16.msra.mxu1 %v1528_v12 }
 0x612   : > { %1444 = vmatprep.subr.bf16.mxu1 %v1663_v0 }
 0x615   : > { %1445 = vmatpush3.bf16.msra.mxu1 %v1529_v6 }
 0x616   : > { %1446 = vmatprep.subr.bf16.mxu1 %v1663_v0  ;;  %v1326_v0 = vld [vmem:[%s2050_s9] ss:$0 sm:$0xff] }
 0x619   : > { %1447 = vmatpush3.bf16.msra.mxu1 %v1530_v23 }
 0x69c   : > { %v1002_v4 = vpop.xlane.xlu0 %1001 }
 0x69d   : > { %v1004_v5 = vmul.f32 0.03125, %v1002_v4 }
 0x69f   : > { %v1005_v7 = vsub.f32 %v997_v61, %v1004_v5 }
 0x6a1   : > { %v1006_v8 = vmul.f32 %v1005_v7, %v1005_v7 }
 0x6a3   : > { %v1007_v9 = vsel %vm421_vm1, %v1006_v8, 0.0 }
 0x6a4   : > { %1008 = vadd.xlane.f32.xlu1 %v1007_v9 }
 0x731   : > { %v1009_v13 = vpop.xlane.xlu1 %1008 }
 0x732   : > { %v1010_v14 = vmul.f32 0.03125, %v1009_v13 }
 0x734   : > { %v1011_v15 = vadd.f32 1e-05, %v1010_v14 }
 0x736   : > { %1547 = vrsqrt.f32 %v1011_v15 }
 0x740   : > { %v1548_v16 = vpop.eup %1547 }
 0x741   : > { %v1013_v18 = vmul.f32 %v1548_v16, %v1005_v7 }
 0x743   : > { %v1020_v20 = vmul.f32 %v1320_v17, %v1013_v18 }
 0x745   : > { %v1027_v21 = vadd.f32 %v1321_v19, %v1020_v20 }
 0x747   : > { %v1028_v22 = vpack.c.bf16 %v1027_v21, %v1027_v21 }
 0x749   : > { %1437 = vmatmul.mubr.msk.bf16.vlgmr.msra.gmra.mrb[20].mxu0 %vm421_vm1, %v1028_v22 }
 0x81c   : > { %v1089_v25 = vpop.f32.mrb[20].mxu0 }
 0x81d   : > { %v1090_v26 = vadd.f32 %v1322_v24, %v1089_v25  ;;  %v1438_v27 = vpop.f32.mrb[21].mxu0 }
 0x81e   : > { %v1092_v28 = vpop.f32.mrb[22].mxu0 }
 0x81f   : > { %vm1095_vm7 = vcmp.gt.f32.partialorder %v1090_v26, 0.0  ;;  %v1096_v29 = vmul.f32 0.01, %v1090_v26  ;;  %v1439_v30 = vpop.f32.mrb[23].mxu0 }
 0x821   : > { %v1097_v31 = vsel %vm1095_vm7, %v1090_v26, %v1096_v29 }
 0x822   : > { %v1098_v32 = vpack.c.bf16 %v1097_v31, %v1097_v31 }
 0x824   : > { %1449 = vmatmul.mubr.msk.bf16.vlgmr.msra.gmra.mrb[20].mxu1 %vm1138_vm8, %v1098_v32 }
 0x8f7   : > { %v1176_v33 = vpop.f32.mrb[20].mxu1 }
 0x8f8   : > { %v1177_v34 = vadd.f32 %v1326_v0, %v1176_v33  ;;  %v1450_v35 = vpop.f32.mrb[21].mxu1 }
 0x8f9   : > { %v1179_v36 = vpop.f32.mrb[22].mxu1 }
 0x8fa   : > { %v1451_v37 = vpop.f32.mrb[23].mxu1  ;;  %v1182_v38 = vadd.f32 %v1177_v34, %v1027_v21 }
 0x8fc   : > { %v1185_v39 = vsel %vm421_vm1, %v1182_v38, 0.0 }
 0x8fd   : > { %1186 = vadd.xlane.f32.xlu0 %v1185_v39 }
 0x98a   : > { %v1187_v40 = vpop.xlane.xlu0 %1186 }
 0x98b   : > { %v1188_v41 = vmul.f32 0.03125, %v1187_v40 }
 0x98d   : > { %v1189_v42 = vsub.f32 %v1182_v38, %v1188_v41 }
 0x98f   : > { %v1190_v43 = vmul.f32 %v1189_v42, %v1189_v42 }
 0x991   : > { %v1191_v44 = vsel %vm421_vm1, %v1190_v43, 0.0 }
 0x992   : > { %1192 = vadd.xlane.f32.xlu0 %v1191_v44 }
 0xa1f   : > { %v1193_v45 = vpop.xlane.xlu0 %1192 }
 0xa20   : > { %v1194_v46 = vmul.f32 0.03125, %v1193_v45 }
 0xa22   : > { %v1195_v47 = vadd.f32 1e-05, %v1194_v46 }
 0xa24   : > { %1549 = vrsqrt.f32 %v1195_v47 }
 0xa2e   : > { %v1550_v48 = vpop.eup %1549 }
 0xa2f   : > { %v1197_v50 = vmul.f32 %v1550_v48, %v1189_v42 }
 0xa31   : > { %v1204_v52 = vmul.f32 %v1332_v49, %v1197_v50 }
 0xa33   : > { %v1211_v53 = vadd.f32 %v1333_v51, %v1204_v52 }
 0xa35   : > { %1212 = vst.msk [vmem:[%s397_s28] sm:$0xff] %vm421_vm1, %v1211_v53 }
 0xa36   : > { %1602 = shalt.err (!%p1599_p10)
}
 0xa37   : > { %s1603_s21 = scalar_lea.hbm %s1998_s1, 128  ;;  %s1607_s28 = scalar_lea.hbm %s2053_s12, 256 }
 0xa38   : > { %p1604_p11 = scmp.ne.s32.totalorder %s1998_s1, %s1603_s21  ;;  %p1608_p4 = scmp.lt.u32.totalorder %s1998_s1, %s2053_s12 }
 0xa39   : > { %p1609_p3 = scmp.lt.u32.totalorder %s1607_s28, %s1603_s21  ;;  %p1611_p9 = scmp.lt.u32.totalorder %s1603_s21, %s1998_s1 }
 0xa3a   : > { %p1605_p0 = pnand %p1604_p11, %p2069_p12 }
 0xa3b   : > { %p1610_p8 = por %p1609_p3, %p1608_p4 }
 0xa3c   : > { %p1606_p2 = pneg %p1605_p0 }
 0xa3d   : > { %p1612_p13 = por %p1611_p9, %p1610_p8 }
 0xa3f   : > { %p1613_p1 = pnand %p1612_p13, %p1606_p2 }
 0xa41   : > { %1616 = shalt.err (!%p1613_p1)
}
 0xa42   : > { %1456 = dma.vmem_to_hbm [thread:$0]  (%p2069_p12), %s2000_s29, 128, %s1998_s1, %s1214_s26  }
 0xa43 PF: > { %p1468_p5 = scmp.ge.s32.totalorder %s1657_s16, 2  ;;  %s1239_s27 = sand.u32 1, %s1645_s13  }
 0xa44   : > { %p2070_p6 = scmp.ne.s32.totalorder %s2060_s23, 0  ;;  %s1240_s0 = scalar_lea.sflag [#allocation6], %s1239_s27 }
 0xa46   : > { %p1463_p7 = pnand %p1468_p5, %p2070_p6 }
 0xa48   : > { %1640 = dma.done.wait (!%p1463_p7), %s1240_s0, 128  }
 0xa49   : > { %1642 = vsyncadd (!%p1463_p7), %s1240_s0, 4294967168  ;;  %s2071_s24 = sld [smem:[#allocation11_spill]]  ;;  %p27_p10 = scmp.ge.s32.totalorder %s1782_s18, 4  }
 0xa4a   : > { %s2072_s13 = smov %s1649_s14  ;;  %s2073_s14 = smov %s1653_s15 }
 0xa4b   : > { %s2075_s16 = smov %s1782_s18  ;;  %29 = sbr.rel (!%p27_p10) target bundleno = 16 (0x10), region = 104 }
 0xa4f   : > { %s2074_s15 = smov %s2071_s24 }
 0xa52   :  { %1245 = vsyncpa [#allocation5], 1 }
 0xa53   :  { %1247 = vsyncpa [#allocation5 + $0x1], 1 }
 0xa54   :  { %1248 = vsyncpa [#allocation6], 1 }
 0xa55   :  { %1250 = vsyncpa [#allocation6 + $0x1], 1 }

</bundles_post_ra>
